<compile_context>
chip_gen: v5e
topology: v5e:2x2
jax: 0.10.0
libtpu: 0.0.40
codegen_flags: <defaults>
</compile_context>

<pallas_src>
import functools

import jax
import jax.numpy as jnp
from jax.experimental import pallas as pl
from jax.experimental.pallas import tpu as pltpu


def _round_up(x, m):
    return ((x + m - 1) // m) * m


def lr_kernel(params_ref, xt_ref, o_ref):
    """params_ref: SMEM [d_in + 1] = [w_0, ..., w_{d_in-1}, b]
       xt_ref:     VMEM [d_in, TN]  (features on sublanes, samples on lanes)
       o_ref:      VMEM [1, TN]     (lane-dense output slab)
    """
    d_in = xt_ref.shape[0]
    # z = sum_j x_j * w_j + b  -- pure VPU elementwise, no MXU round-trip.
    # Bias folded into the first term; the tiny static loop (d_in = 2) unrolls.
    z = xt_ref[0:1, :] * params_ref[0] + params_ref[d_in]
    for j in range(1, d_in):
        z = z + xt_ref[j:j + 1, :] * params_ref[j]
    # Sigmoid: exp on the EUP (free slot); exact 1/(1+e) keeps f32 tail accuracy.
    o_ref[...] = (1.0 / (1.0 + jnp.exp(-z))).astype(o_ref.dtype)


@functools.partial(jax.jit, static_argnames=("row_tile",))
def lr_forward(x, weight, bias, *, row_tile=32768):
    """Forward pass of LR: sigmoid(x @ weight.T + bias).

    x:      [N, d_in]  float32
    weight: [1, d_in]  float32 (torch.nn.Linear layout: [out_features, in_features])
    bias:   [1]        float32
    returns [N, 1]     float32
    """
    n, d_in = x.shape
    d_out, d_in_w = weight.shape
    assert d_in_w == d_in and d_out == 1, "kernel specialised to Linear(d_in, 1)"

    # Weights + bias as SMEM scalars: removes two tiny padded VMEM operands.
    params = jnp.concatenate(
        [weight.reshape(-1).astype(jnp.float32),
         bias.reshape(-1).astype(jnp.float32)]
    )

    # Lane-dense layout: samples map to the lane axis; tile N in 128-multiples.
    row_tile = _round_up(row_tile, 128)
    tn = min(row_tile, _round_up(n, 128))
    n_pad = _round_up(n, tn)

    xt = x.T  # [d_in, N] -- wrapper-side layout plumbing for lane-dense access.
    if n_pad != n:
        xt = jnp.pad(xt, ((0, 0), (0, n_pad - n)))

    out = pl.pallas_call(
        lr_kernel,
        out_shape=jax.ShapeDtypeStruct((d_out, n_pad), x.dtype),
        grid=(n_pad // tn,),
        in_specs=[
            pl.BlockSpec(memory_space=pltpu.MemorySpace.SMEM),  # params [d_in+1]
            pl.BlockSpec((d_in, tn), lambda i: (0, i)),         # x^T lane tile
        ],
        out_specs=pl.BlockSpec((d_out, tn), lambda i: (0, i)),
        compiler_params=pltpu.CompilerParams(
            # Row tiles are independent: shard across both TCs on v7x.
            dimension_semantics=("parallel",),
        ),
    )(params, xt)

    # Back to the nn.Linear output layout [N, 1].
    return out[:, :n].T


if __name__ == "__main__":
    key = jax.random.PRNGKey(0)
    kx, kw, kb, kx2, kx3 = jax.random.split(key, 5)

    # Module shapes: nn.Linear(2, 1) -> weight [1, 2], bias [1].
    n, d_in, d_out = 8, 2, 1
    x = jax.random.normal(kx, (n, d_in), dtype=jnp.float32)

    # Deterministic init mimicking PyTorch's default U(-1/sqrt(in), 1/sqrt(in)).
    bound = 1.0 / jnp.sqrt(jnp.float32(d_in))
    weight = jax.random.uniform(kw, (d_out, d_in), minval=-bound, maxval=bound,
                                dtype=jnp.float32)
    bias = jax.random.uniform(kb, (d_out,), minval=-bound, maxval=bound,
                              dtype=jnp.float32)

    out = jax.block_until_ready(lr_forward(x, weight, bias))
    ref = jax.nn.sigmoid(x @ weight.T + bias)
    assert out.shape == (n, d_out)
    assert out.dtype == jnp.float32
    assert jnp.allclose(out, ref, atol=1e-5), "mismatch vs reference (small)"

    # Multi-tile + lane-padding path (N not a multiple of the tile).
    n2 = 300
    x2 = jax.random.normal(kx2, (n2, d_in), dtype=jnp.float32)
    out2 = jax.block_until_ready(lr_forward(x2, weight, bias, row_tile=128))
    ref2 = jax.nn.sigmoid(x2 @ weight.T + bias)
    assert out2.shape == (n2, d_out)
    assert jnp.allclose(out2, ref2, atol=1e-5), "mismatch vs reference (tiled)"

    # Multi-step grid without padding (N an exact multiple of the tile).
    n3 = 1024
    x3 = jax.random.normal(kx3, (n3, d_in), dtype=jnp.float32)
    out3 = jax.block_until_ready(lr_forward(x3, weight, bias, row_tile=256))
    ref3 = jax.nn.sigmoid(x3 @ weight.T + bias)
    assert out3.shape == (n3, d_out)
    assert jnp.allclose(out3, ref3, atol=1e-5), "mismatch vs reference (multi-step)"

    print("KERNEL_OK")
</pallas_src>

<mosaic_0001>
module attributes {stable_mosaic.version = 11 : i64} {
  func.func @lr_kernel(%arg0: i32, %arg1: memref<3xf32, #tpu.memory_space<smem>>, %arg2: memref<2x128xf32, #tpu.memory_space<vmem>>, %arg3: memref<1x128xf32, #tpu.memory_space<vmem>>) attributes {dimension_semantics = [#tpu.dimension_semantics<parallel>], iteration_bounds = array<i64: 1>, scalar_prefetch = 0 : i64, scratch_operands = 0 : i64, tpu.core_type = #tpu.core_type<tc>, window_params = [{transform_indices = @transform_0, window_bounds = array<i64: 3>}, {transform_indices = @transform_1, window_bounds = array<i64: 2, 128>}, {transform_indices = @transform_2, window_bounds = array<i64: 1, 128>}]} {
    %c0 = arith.constant 0 : index
    %c0_0 = arith.constant 0 : index
    %0 = vector.load %arg2[%c0, %c0_0] : memref<2x128xf32, #tpu.memory_space<vmem>>, vector<1x128xf32>
    %c0_1 = arith.constant 0 : index
    %1 = memref.load %arg1[%c0_1] : memref<3xf32, #tpu.memory_space<smem>>
    %2 = vector.broadcast %1 : f32 to vector<1x128xf32>
    %3 = arith.mulf %0, %2 : vector<1x128xf32>
    %c2 = arith.constant 2 : index
    %4 = memref.load %arg1[%c2] : memref<3xf32, #tpu.memory_space<smem>>
    %5 = vector.broadcast %4 : f32 to vector<1x128xf32>
    %6 = arith.addf %3, %5 : vector<1x128xf32>
    %c1 = arith.constant 1 : index
    %c0_2 = arith.constant 0 : index
    %7 = vector.load %arg2[%c1, %c0_2] : memref<2x128xf32, #tpu.memory_space<vmem>>, vector<1x128xf32>
    %c1_3 = arith.constant 1 : index
    %8 = memref.load %arg1[%c1_3] : memref<3xf32, #tpu.memory_space<smem>>
    %9 = vector.broadcast %8 : f32 to vector<1x128xf32>
    %10 = arith.mulf %7, %9 : vector<1x128xf32>
    %11 = arith.addf %6, %10 : vector<1x128xf32>
    %cst = arith.constant 0.000000e+00 : f32
    %12 = vector.broadcast %cst : f32 to vector<1x128xf32>
    %13 = arith.subf %12, %11 : vector<1x128xf32>
    %14 = math.exp %13 : vector<1x128xf32>
    %cst_4 = arith.constant 1.000000e+00 : f32
    %15 = vector.broadcast %cst_4 : f32 to vector<1x128xf32>
    %16 = arith.addf %15, %14 : vector<1x128xf32>
    %cst_5 = arith.constant 1.000000e+00 : f32
    %17 = vector.broadcast %cst_5 : f32 to vector<1x128xf32>
    %18 = arith.divf %17, %16 : vector<1x128xf32>
    %c0_6 = arith.constant 0 : index
    %c0_7 = arith.constant 0 : index
    %19 = vector.load %arg3[%c0_6, %c0_7] : memref<1x128xf32, #tpu.memory_space<vmem>>, vector<1x128xf32>
    tpu.vector_store %arg3[%c0_6, %c0_7], %18 {strides = array<i32>} : memref<1x128xf32, #tpu.memory_space<vmem>>, vector<1x128xf32>,
    return
  }
  func.func @transform_0(%arg0: i32) -> i32 {
    %c0_i32 = arith.constant 0 : i32
    %c0_i32_0 = arith.constant 0 : i32
    return %c0_i32 : i32
  }
  func.func @transform_1(%arg0: i32) -> (i32, i32) {
    %c0_i32 = arith.constant 0 : i32
    %c0_i32_0 = arith.constant 0 : i32
    return %c0_i32, %arg0 : i32, i32
  }
  func.func @transform_2(%arg0: i32) -> (i32, i32) {
    %c0_i32 = arith.constant 0 : i32
    %c0_i32_0 = arith.constant 0 : i32
    return %c0_i32, %arg0 : i32, i32
  }
}

</mosaic_0001>

<bundles_post_ra>
// kernel: lr_forward.1
= control target key start
LH: loop header
LB: loop body
LE: loop exit
PB: predicated region body
PF: predicated region fallthrough
CT: control target
= control target key end

     0   :  { %7 = vsyncpa [#allocation3], 0  ;;  %s82_s12 = smov [#allocation2]   ;;  %s110_s0 = inlined_call_operand.vmem [shape: f32[3], index: 0, kind: input, shape index: {}]   ;;  %s111_s1 = inlined_call_operand.vmem [shape: f32[2,128], index: 1, kind: input, shape index: {}]   ;;  %s112_s2 = inlined_call_operand.vmem [shape: f32[1,128], index: 2, kind: output, shape index: {}]  }
   0x1   :  { %s13_s11 = sshll.u32 %s110_s0, 4  ;;  %s14_s11 = int_to_ptr.vmem [resolvable:$true] %s13_s11 }
   0x2   :  { %16 = dma.vmem_to_smem %s14_s11, 16, %s82_s12, [#allocation3]  }
   0x3   :  { %80 = dma.done.wait [#allocation3], 16  }
   0x4   :  { %81 = vsyncadd [#allocation3], 4294967280 }
   0x5   :  { %23 = sfence }
   0x6   :  { %s25_s13 = sld [smem:[#allocation2]]  ;;  %v24_v0 = vld [vmem:[%s111_s1] sm:$0x1]  ;;  %v31_v2 = vld [vmem:[%s111_s1 + $0x1] sm:$0x1] }
   0x7   :  { %s61_s14 = sld [smem:[#allocation2 + $0x2]] }
   0x8   :  { %s62_s15 = sld [smem:[#allocation2 + $0x1]] }
   0xc   :  { %v26_v1 = vstv %s25_s13 }
   0xd   :  { %v27_v3 = vmul.f32 %v26_v1, %v24_v0  ;;  %v29_v4 = vstv %s61_s14 }
   0xe   :  { %v33_v5 = vstv %s62_s15 }
   0xf   :  { %v30_v6 = vadd.f32 %v29_v4, %v27_v3  ;;  %v34_v7 = vmul.f32 %v33_v5, %v31_v2 }
  0x11   :  { %v35_v8 = vadd.f32 %v34_v7, %v30_v6 }
  0x13   :  { %v36_v9 = vsub.f32 0.0, %v35_v8 }
  0x15   :  { %v37_v10 = vmul.f32 1.442695, %v36_v9 }
  0x17   :  { %64 = vpow2.f32 %v37_v10 }
  0x1d   :  { %v65_v11 = vpop.eup %64 }
  0x1e   :  { %v39_v12 = vadd.f32 1.0, %v65_v11 }
  0x20   :  { %66 = vrcp.f32 %v39_v12  ;;  %v51_v15 = vand.u32 2147483648, %v39_v12  ;;  %vm45_vm0 = vweird.f32 %v39_v12  ;;  %v49_v17 = vand.u32 2147483647, %v39_v12 }
  0x22   :  { %v52_v19 = vor.u32 1.1754944e-38, %v51_v15  ;;  %vm50_vm3 = vcmp.eq.f32.partialorder %v49_v17, 8.507059e+37 }
  0x26   :  { %v67_v13 = vpop.eup %66 }
  0x27   :  { %v41_v14 = vmul.f32 %v67_v13, %v39_v12  ;;  %vm46_vm1 = vweird.f32 %v67_v13 }
  0x28   :  { %vm47_vm2 = vmor %vm45_vm0, %vm46_vm1 }
  0x29   :  { %v42_v16 = vsub.f32 1.0, %v41_v14 }
  0x2b   :  { %v43_v18 = vmul.f32 %v67_v13, %v42_v16 }
  0x2d   :  { %v44_v20 = vadd.f32 %v67_v13, %v43_v18 }
  0x2f   :  { %v48_v21 = vsel %vm47_vm2, %v67_v13, %v44_v20 }
  0x30   :  { %v53_v22 = vsel %vm50_vm3, %v52_v19, %v48_v21 }
  0x31   :  { %55 = vst [vmem:[%s112_s2] sm:$0x1] %v53_v22 }
  0x32   :  { %60 = vsyncpa [#allocation3], 1 }

</bundles_post_ra>
